<compile_context>
chip_gen: v7x
topology: tpu7x:2x2x1
jax: 0.10.0
libtpu: 0.0.40
codegen_flags: <defaults>
</compile_context>

<pallas_src>
import functools

import jax
import jax.numpy as jnp
from jax.experimental import pallas as pl
from jax.experimental.pallas import tpu as pltpu


# --------------------------------------------------------------------------
# Kernels
# --------------------------------------------------------------------------
def _ffn_kernel_fused(x_ref, w1_ref, b1_ref, w2_ref, b2_ref, o_ref):
    """num_k == 1: whole hidden dim resident -> no accumulator round-trips."""
    h = jnp.dot(x_ref[...], w1_ref[...], preferred_element_type=jnp.float32)
    h = jnp.maximum(h + b1_ref[...], 0.0)
    # TODO(synk): dropout is identity in eval mode; training-mode dropout
    # would use pltpu.prng_seed + pltpu.prng_random_bits.
    y = jnp.dot(h.astype(w2_ref.dtype), w2_ref[...],
                preferred_element_type=jnp.float32)
    o_ref[...] = (y + b2_ref[...]).astype(o_ref.dtype)


def _ffn_kernel_chunked(x_ref, w1_ref, b1_ref, w2_ref, b2_ref, o_ref, acc_ref):
    """num_k > 1: hidden dim chunked along the grid's inner ('arbitrary') axis."""
    k = pl.program_id(1)

    h = jnp.dot(x_ref[...], w1_ref[...], preferred_element_type=jnp.float32)
    h = jnp.maximum(h + b1_ref[...], 0.0)
    part = jnp.dot(h.astype(w2_ref.dtype), w2_ref[...],
                   preferred_element_type=jnp.float32)

    @pl.when(k == 0)
    def _():
        # Direct assignment (no zero-init pass) and fold b2 into the init.
        acc_ref[...] = part + b2_ref[...]

    @pl.when(k > 0)
    def _():
        acc_ref[...] += part

    @pl.when(k == pl.num_programs(1) - 1)
    def _():
        o_ref[...] = acc_ref[...].astype(o_ref.dtype)


# --------------------------------------------------------------------------
# Helpers
# --------------------------------------------------------------------------
def _round_up(n, m):
    return ((n + m - 1) // m) * m


def _default_vmem_limit():
    try:
        cap = pltpu.get_tpu_info().vmem_capacity_bytes
    except Exception:
        cap = 64 * 1024 * 1024            # conservative (v7x-sized) fallback
    return int(min(100 * 1024 * 1024, (cap * 3) // 4))


@functools.lru_cache(maxsize=1)
def _supports_single_buffering():
    """Probe Buffered(1) support once and cache the decision (no broad
    try/except around the real kernel call)."""
    try:
        def _probe(x_ref, w_ref, o_ref):
            o_ref[...] = x_ref[...] + w_ref[...]

        fn = pl.pallas_call(
            _probe,
            out_shape=jax.ShapeDtypeStruct((16, 128), jnp.float32),
            grid=(2,),
            in_specs=[
                pl.BlockSpec((8, 128), lambda i: (i, 0)),
                pl.BlockSpec((8, 128), lambda i: (0, 0),
                             pipeline_mode=pl.Buffered(1)),
            ],
            out_specs=pl.BlockSpec((8, 128), lambda i: (i, 0)),
        )
        jax.block_until_ready(fn(jnp.zeros((16, 128), jnp.float32),
                                 jnp.zeros((8, 128), jnp.float32)))
        return True
    except Exception:
        return False


def _vmem_footprint(rt, th, idim_p, hidden_p, x_it, w_it, out_it, wbuf):
    """Estimated VMEM bytes for one configuration (whole pipeline picture)."""
    num_k = hidden_p // th
    wb = wbuf if num_k == 1 else 2                    # chunked weights stay 2x
    b = 0
    b += 2 * rt * idim_p * x_it                       # x tile, double-buffered
    b += 2 * rt * idim_p * out_it                     # out tile, double-buffered
    b += wb * 2 * idim_p * th * w_it                  # w1^T + w2^T chunks
    b += wb * (th + idim_p) * 4                       # f32 bias chunks
    b += rt * th * (4 + w_it)                         # h (f32) + its cast copy
    if num_k > 1:
        b += rt * idim_p * 4                          # f32 accumulator scratch
    return b


def _choose_tiles(rows, idim_p, hidden_p, x_it, w_it, out_it,
                  budget, row_tile, hidden_tile, wbuf):
    # Sublane packing: rt must be a multiple of 16 for bf16 tiles, 8 for f32,
    # 32 for int8/fp8 (min tile constraint).
    rt_min = max(8 * (4 // x_it), 8 * (4 // out_it), 8)

    def clamp_rt(rt):
        return max(rt_min, min(_round_up(rt, rt_min), _round_up(rows, rt_min)))

    rt_cands = ([clamp_rt(row_tile)] if row_tile
                else list(dict.fromkeys([clamp_rt(512), clamp_rt(256)])))

    # Prefer the un-chunked regime (no accumulator, weights resident) with the
    # largest row tile that fits the budget.
    if hidden_tile is None or hidden_tile == hidden_p:
        for rt in rt_cands:
            if _vmem_footprint(rt, hidden_p, idim_p, hidden_p,
                               x_it, w_it, out_it, wbuf) <= budget:
                return rt, hidden_p

    # Chunked regime. Note: weight chunks are re-streamed once per row tile, so
    # the largest fitting row tile is tried first to cut that HBM traffic.
    if hidden_tile is not None:
        th_cands = [hidden_tile]
    else:
        th_cands = [t for t in range(hidden_p, 127, -128)
                    if hidden_p % t == 0 and t < hidden_p]
        if not th_cands:
            th_cands = [hidden_p]
    for rt in rt_cands:
        for th in th_cands:                       # descending: prefers th >= 256
            if _vmem_footprint(rt, th, idim_p, hidden_p,
                               x_it, w_it, out_it, wbuf) <= budget:
                return rt, th
    return rt_cands[-1], th_cands[-1]             # last resort: smallest config


def prepare_params(w1, b1, w2, b2, *, compute_dtype=jnp.bfloat16):
    """One-time parameter preparation (do NOT call per forward):
       - transpose PyTorch nn.Linear weights into matmul layout,
       - zero-pad feature dims to lane-dense multiples of 128,
       - cast weights to the MXU compute dtype (default bf16; f32 accumulation
         is preserved via preferred_element_type inside the kernel).
       Biases are kept in f32 (added after the f32-accumulating dots)."""
    hidden, idim = w1.shape
    idim_p = _round_up(idim, 128)
    hidden_p = _round_up(hidden, 128)
    wdt = jnp.dtype(compute_dtype)

    w1t = jnp.zeros((idim_p, hidden_p), wdt).at[:idim, :hidden].set(
        jnp.transpose(w1).astype(wdt))
    w2t = jnp.zeros((hidden_p, idim_p), wdt).at[:hidden, :idim].set(
        jnp.transpose(w2).astype(wdt))
    b1r = jnp.zeros((1, hidden_p), jnp.float32).at[:, :hidden].set(
        b1.astype(jnp.float32))
    b2r = jnp.zeros((1, idim_p), jnp.float32).at[:, :idim].set(
        b2.astype(jnp.float32))
    return {"w1t": w1t, "b1": b1r, "w2t": w2t, "b2": b2r,
            "idim": idim, "hidden": hidden}


# --------------------------------------------------------------------------
# Forward
# --------------------------------------------------------------------------
def positionwise_feed_forward(x, params, *, row_tile=None, hidden_tile=None,
                              vmem_limit_bytes=None):
    """x: (batch, seq, idim); params from prepare_params()."""
    batch, seq, idim = x.shape
    assert idim == params["idim"]
    w1t, b1, w2t, b2 = params["w1t"], params["b1"], params["w2t"], params["b2"]
    idim_p, hidden_p = w1t.shape
    out_dtype = x.dtype

    if vmem_limit_bytes is None:
        vmem_limit_bytes = _default_vmem_limit()
    budget = int(vmem_limit_bytes * 0.9)          # headroom for internal scratch

    if hidden_tile is not None:
        assert hidden_tile % 128 == 0 and hidden_p % hidden_tile == 0

    rows = batch * seq
    # Cast x to the compute dtype ONCE in the wrapper (not per grid step).
    x2d = x.reshape(rows, idim).astype(w1t.dtype)

    single_buf_ok = _supports_single_buffering()
    wbuf = 1 if single_buf_ok else 2

    x_it = x2d.dtype.itemsize
    w_it = w1t.dtype.itemsize
    out_it = jnp.dtype(out_dtype).itemsize

    rt, th = _choose_tiles(rows, idim_p, hidden_p, x_it, w_it, out_it,
                           budget, row_tile, hidden_tile, wbuf)
    assert th % 128 == 0 and hidden_p % th == 0
    num_k = hidden_p // th

    rows_p = _round_up(rows, rt)
    if rows_p != rows or idim_p != idim:
        # Production shapes should already have idim % 128 == 0 (lane-dense
        # output stores); this pad only triggers for non-aligned/toy shapes.
        x2d = jnp.pad(x2d, ((0, rows_p - rows), (0, idim_p - idim)))

    # Advisory cost estimate so XLA schedules the surrounding pad/reshape ops.
    weight_streams = 1 if num_k == 1 else rows_p // rt
    cost = pl.CostEstimate(
        flops=4 * rows_p * idim_p * hidden_p,
        transcendentals=0,
        bytes_accessed=(rows_p * idim_p * (x_it + out_it)
                        + 2 * idim_p * hidden_p * w_it * weight_streams))

    if num_k == 1:
        def inv(shape):
            # Grid-invariant block: a second pipeline buffer is pure VMEM
            # waste, so request single buffering when supported.
            if single_buf_ok:
                return pl.BlockSpec(shape, lambda i: (0, 0),
                                    pipeline_mode=pl.Buffered(1))
            return pl.BlockSpec(shape, lambda i: (0, 0))

        call = pl.pallas_call(
            _ffn_kernel_fused,
            out_shape=jax.ShapeDtypeStruct((rows_p, idim_p), out_dtype),
            grid_spec=pltpu.PrefetchScalarGridSpec(
                num_scalar_prefetch=0,
                grid=(rows_p // rt,),
                in_specs=[
                    pl.BlockSpec((rt, idim_p), lambda i: (i, 0)),   # x
                    inv((idim_p, hidden_p)),                        # w1^T
                    inv((1, hidden_p)),                             # b1
                    inv((hidden_p, idim_p)),                        # w2^T
                    inv((1, idim_p)),                               # b2
                ],
                out_specs=pl.BlockSpec((rt, idim_p), lambda i: (i, 0)),
            ),
            compiler_params=pltpu.CompilerParams(
                # TODO(synk): on v7x, switch the row axis to pltpu.CORE_PARALLEL
                # if plain "parallel" does not shard across both TensorCores.
                dimension_semantics=("parallel",),
                vmem_limit_bytes=vmem_limit_bytes),
            cost_estimate=cost,
        )
    else:
        call = pl.pallas_call(
            _ffn_kernel_chunked,
            out_shape=jax.ShapeDtypeStruct((rows_p, idim_p), out_dtype),
            grid_spec=pltpu.PrefetchScalarGridSpec(
                num_scalar_prefetch=0,
                grid=(rows_p // rt, num_k),
                in_specs=[
                    pl.BlockSpec((rt, idim_p), lambda i, k: (i, 0)),   # x
                    pl.BlockSpec((idim_p, th), lambda i, k: (0, k)),   # w1^T chunk
                    pl.BlockSpec((1, th), lambda i, k: (0, k)),        # b1 chunk
                    pl.BlockSpec((th, idim_p), lambda i, k: (k, 0)),   # w2^T chunk
                    pl.BlockSpec((1, idim_p), lambda i, k: (0, 0)),    # b2
                ],
                out_specs=pl.BlockSpec((rt, idim_p), lambda i, k: (i, 0)),
                scratch_shapes=[pltpu.VMEM((rt, idim_p), jnp.float32)],
            ),
            compiler_params=pltpu.CompilerParams(
                dimension_semantics=("parallel", "arbitrary"),
                vmem_limit_bytes=vmem_limit_bytes),
            cost_estimate=cost,
        )

    out2d = call(x2d, w1t, b1, w2t, b2)
    return out2d[:rows, :idim].reshape(batch, seq, idim)


# --------------------------------------------------------------------------
# Self-test
# --------------------------------------------------------------------------
if __name__ == "__main__":
    # Small shapes consistent with the module's forward.
    batch, seq, idim, hidden = 2, 8, 32, 64

    key = jax.random.PRNGKey(0)
    k_x, k_w1, k_b1, k_w2, k_b2 = jax.random.split(key, 5)

    x = jax.random.normal(k_x, (batch, seq, idim), dtype=jnp.float32)

    # Deterministic parameter init (PyTorch nn.Linear parameter shapes).
    bound1 = 1.0 / (idim ** 0.5)
    bound2 = 1.0 / (hidden ** 0.5)
    w1 = jax.random.uniform(k_w1, (hidden, idim), jnp.float32, -bound1, bound1)
    b1 = jax.random.uniform(k_b1, (hidden,), jnp.float32, -bound1, bound1)
    w2 = jax.random.uniform(k_w2, (idim, hidden), jnp.float32, -bound2, bound2)
    b2 = jax.random.uniform(k_b2, (idim,), jnp.float32, -bound2, bound2)

    # Reference in plain JAX (eval mode: dropout = identity).
    h_ref = jnp.maximum(x @ w1.T + b1, 0.0)
    y_ref = h_ref @ w2.T + b2

    # f32 path (strict numerical check at this tiny K).
    params_f32 = prepare_params(w1, b1, w2, b2, compute_dtype=jnp.float32)
    y = positionwise_feed_forward(x, params_f32)
    jax.block_until_ready(y)
    assert y.shape == (batch, seq, idim)
    assert jnp.allclose(y, y_ref, atol=1e-5, rtol=1e-5)

    # Default bf16 MXU path (bf16 weights + bf16 activations, f32 accumulation).
    params_bf16 = prepare_params(w1, b1, w2, b2)          # default: bf16 weights
    y_bf16 = positionwise_feed_forward(x.astype(jnp.bfloat16), params_bf16)
    jax.block_until_ready(y_bf16)
    assert y_bf16.dtype == jnp.bfloat16
    assert jnp.allclose(y_bf16.astype(jnp.float32), y_ref, atol=1e-1, rtol=5e-2)

    # f32 input with bf16 weights (wrapper casts x once; output stays f32).
    y_mixed = positionwise_feed_forward(x, params_bf16)
    jax.block_until_ready(y_mixed)
    assert y_mixed.dtype == jnp.float32
    assert jnp.allclose(y_mixed, y_ref, atol=1e-1, rtol=5e-2)

    print("KERNEL_OK")
</pallas_src>

<mosaic_0001>
module attributes {stable_mosaic.version = 11 : i64} {
  func.func @_probe(%arg0: i32, %arg1: memref<8x128xf32, #tpu.memory_space<vmem>>, %arg2: memref<8x128xf32, #tpu.memory_space<vmem>>, %arg3: memref<8x128xf32, #tpu.memory_space<vmem>>) attributes {dimension_semantics = [#tpu.dimension_semantics<arbitrary>], iteration_bounds = array<i64: 2>, scalar_prefetch = 0 : i64, scratch_operands = 0 : i64, tpu.core_type = #tpu.core_type<tc>, window_params = [{transform_indices = @transform_0, window_bounds = array<i64: 8, 128>}, {pipeline_mode = #tpu.pipeline_mode<synchronous>, transform_indices = @transform_1, window_bounds = array<i64: 8, 128>}, {transform_indices = @transform_2, window_bounds = array<i64: 8, 128>}]} {
    %c0 = arith.constant 0 : index
    %c0_0 = arith.constant 0 : index
    %0 = vector.load %arg1[%c0, %c0_0] : memref<8x128xf32, #tpu.memory_space<vmem>>, vector<8x128xf32>
    %c0_1 = arith.constant 0 : index
    %c0_2 = arith.constant 0 : index
    %1 = vector.load %arg2[%c0_1, %c0_2] : memref<8x128xf32, #tpu.memory_space<vmem>>, vector<8x128xf32>
    %2 = arith.addf %0, %1 : vector<8x128xf32>
    %c0_3 = arith.constant 0 : index
    %c0_4 = arith.constant 0 : index
    %3 = vector.load %arg3[%c0_3, %c0_4] : memref<8x128xf32, #tpu.memory_space<vmem>>, vector<8x128xf32>
    tpu.vector_store %arg3[%c0_3, %c0_4], %2 {strides = array<i32>} : memref<8x128xf32, #tpu.memory_space<vmem>>, vector<8x128xf32>,
    return
  }
  func.func @transform_0(%arg0: i32) -> (i32, i32) {
    %c0_i32 = arith.constant 0 : i32
    %c0_i32_0 = arith.constant 0 : i32
    return %arg0, %c0_i32 : i32, i32
  }
  func.func @transform_1(%arg0: i32) -> (i32, i32) {
    %c0_i32 = arith.constant 0 : i32
    %c0_i32_0 = arith.constant 0 : i32
    %c0_i32_1 = arith.constant 0 : i32
    return %c0_i32, %c0_i32_0 : i32, i32
  }
  func.func @transform_2(%arg0: i32) -> (i32, i32) {
    %c0_i32 = arith.constant 0 : i32
    %c0_i32_0 = arith.constant 0 : i32
    return %arg0, %c0_i32 : i32, i32
  }
}

module attributes {stable_mosaic.version = 11 : i64} {
  func.func @_ffn_kernel_fused(%arg0: i32, %arg1: memref<16x128xf32, #tpu.memory_space<vmem>>, %arg2: memref<128x128xf32, #tpu.memory_space<vmem>>, %arg3: memref<1x128xf32, #tpu.memory_space<vmem>>, %arg4: memref<128x128xf32, #tpu.memory_space<vmem>>, %arg5: memref<1x128xf32, #tpu.memory_space<vmem>>, %arg6: memref<16x128xf32, #tpu.memory_space<vmem>>) attributes {dimension_semantics = [#tpu.dimension_semantics<parallel>], iteration_bounds = array<i64: 1>, scalar_prefetch = 0 : i64, scratch_operands = 0 : i64, tpu.core_type = #tpu.core_type<tc>, window_params = [{transform_indices = @transform_0, window_bounds = array<i64: 16, 128>}, {pipeline_mode = #tpu.pipeline_mode<synchronous>, transform_indices = @transform_1, window_bounds = array<i64: 128, 128>}, {pipeline_mode = #tpu.pipeline_mode<synchronous>, transform_indices = @transform_2, window_bounds = array<i64: 1, 128>}, {pipeline_mode = #tpu.pipeline_mode<synchronous>, transform_indices = @transform_3, window_bounds = array<i64: 128, 128>}, {pipeline_mode = #tpu.pipeline_mode<synchronous>, transform_indices = @transform_4, window_bounds = array<i64: 1, 128>}, {transform_indices = @transform_5, window_bounds = array<i64: 16, 128>}]} {
    %c0 = arith.constant 0 : index
    %c0_0 = arith.constant 0 : index
    %0 = vector.load %arg1[%c0, %c0_0] : memref<16x128xf32, #tpu.memory_space<vmem>>, vector<16x128xf32>
    %c0_1 = arith.constant 0 : index
    %c0_2 = arith.constant 0 : index
    %1 = vector.load %arg2[%c0_1, %c0_2] : memref<128x128xf32, #tpu.memory_space<vmem>>, vector<128x128xf32>
    %cst = arith.constant dense<0.000000e+00> : vector<16x128xf32>
    %2 = tpu.matmul %0, %1, %cst {dimension_numbers = #tpu.dot_dimension_numbers<[1], [0], [0], [1], [0, 0, 1, 1], [], []>} : vector<16x128xf32>, vector<128x128xf32>, vector<16x128xf32> -> vector<16x128xf32>
    %c0_3 = arith.constant 0 : index
    %c0_4 = arith.constant 0 : index
    %3 = vector.load %arg3[%c0_3, %c0_4] : memref<1x128xf32, #tpu.memory_space<vmem>>, vector<1x128xf32>
    %4 = vector.broadcast %3 : vector<1x128xf32> to vector<16x128xf32>
    %5 = arith.addf %2, %4 : vector<16x128xf32>
    %cst_5 = arith.constant 0.000000e+00 : f32
    %6 = vector.broadcast %cst_5 : f32 to vector<16x128xf32>
    %7 = arith.maximumf %5, %6 : vector<16x128xf32>
    %c0_6 = arith.constant 0 : index
    %c0_7 = arith.constant 0 : index
    %8 = vector.load %arg4[%c0_6, %c0_7] : memref<128x128xf32, #tpu.memory_space<vmem>>, vector<128x128xf32>
    %cst_8 = arith.constant dense<0.000000e+00> : vector<16x128xf32>
    %9 = tpu.matmul %7, %8, %cst_8 {dimension_numbers = #tpu.dot_dimension_numbers<[1], [0], [0], [1], [0, 0, 1, 1], [], []>} : vector<16x128xf32>, vector<128x128xf32>, vector<16x128xf32> -> vector<16x128xf32>
    %c0_9 = arith.constant 0 : index
    %c0_10 = arith.constant 0 : index
    %10 = vector.load %arg5[%c0_9, %c0_10] : memref<1x128xf32, #tpu.memory_space<vmem>>, vector<1x128xf32>
    %11 = vector.broadcast %10 : vector<1x128xf32> to vector<16x128xf32>
    %12 = arith.addf %9, %11 : vector<16x128xf32>
    %c0_11 = arith.constant 0 : index
    %c0_12 = arith.constant 0 : index
    %13 = vector.load %arg6[%c0_11, %c0_12] : memref<16x128xf32, #tpu.memory_space<vmem>>, vector<16x128xf32>
    tpu.vector_store %arg6[%c0_11, %c0_12], %12 {strides = array<i32>} : memref<16x128xf32, #tpu.memory_space<vmem>>, vector<16x128xf32>,
    return
  }
  func.func @transform_0(%arg0: i32) -> (i32, i32) {
    %c0_i32 = arith.constant 0 : i32
    %c0_i32_0 = arith.constant 0 : i32
    return %arg0, %c0_i32 : i32, i32
  }
  func.func @transform_1(%arg0: i32) -> (i32, i32) {
    %c0_i32 = arith.constant 0 : i32
    %c0_i32_0 = arith.constant 0 : i32
    %c0_i32_1 = arith.constant 0 : i32
    return %c0_i32, %c0_i32_0 : i32, i32
  }
  func.func @transform_2(%arg0: i32) -> (i32, i32) {
    %c0_i32 = arith.constant 0 : i32
    %c0_i32_0 = arith.constant 0 : i32
    %c0_i32_1 = arith.constant 0 : i32
    return %c0_i32, %c0_i32_0 : i32, i32
  }
  func.func @transform_3(%arg0: i32) -> (i32, i32) {
    %c0_i32 = arith.constant 0 : i32
    %c0_i32_0 = arith.constant 0 : i32
    %c0_i32_1 = arith.constant 0 : i32
    return %c0_i32, %c0_i32_0 : i32, i32
  }
  func.func @transform_4(%arg0: i32) -> (i32, i32) {
    %c0_i32 = arith.constant 0 : i32
    %c0_i32_0 = arith.constant 0 : i32
    %c0_i32_1 = arith.constant 0 : i32
    return %c0_i32, %c0_i32_0 : i32, i32
  }
  func.func @transform_5(%arg0: i32) -> (i32, i32) {
    %c0_i32 = arith.constant 0 : i32
    %c0_i32_0 = arith.constant 0 : i32
    return %arg0, %c0_i32 : i32, i32
  }
}

</mosaic_0001>

<bundles_post_ra>
// kernel: tpu_custom_call.1
= control target key start
LH: loop header
LB: loop body
LE: loop exit
PB: predicated region body
PF: predicated region fallthrough
CT: control target
= control target key end

     0   :  { %7 = vsyncpa [#allocation3], 0  ;;  %s690_s0 = inlined_call_operand.hbm [shape: f32[16,128], index: 0, kind: input, shape index: {}]   ;;  %s691_s1 = inlined_call_operand.hbm [shape: f32[8,128], index: 1, kind: input, shape index: {}]   ;;  %s692_s2 = inlined_call_operand.hbm [shape: f32[16,128], index: 2, kind: output, shape index: {}]  }
   0x1   :  { %9 = vsyncpa [#allocation3 + $0x1], 0 }
   0x2   :  { %10 = vsyncpa [#allocation6], 0 }
   0x3   :  { %11 = vsyncpa [#allocation4], 0 }
   0x4   :  { %13 = vsyncpa [#allocation4 + $0x1], 0  ;;  %s489_s9 = smov 0   ;;  %s491_s10 = smov 0  }
   0x5   :  { %s493_s11 = smov 0   ;;  %s495_s12 = smov 0  }
   0x6 LB: > { %s510_s13 = sadd.s32 4294967295, %s469_s12   ;;  %s270_s14 = sadd.s32 4294967294, %s469_s12   ;;  %s469_s12 = sphi %s495_s12, %s716_s12   ;;  %s465_s11 = sphi %s493_s11, %s715_s11   ;;  %s461_s10 = sphi %s491_s10, %s714_s10   ;;  %s457_s9 = sphi %s489_s9, %s713_s9  }
   0x7   : > { %p39_p0 = scmp.ne.s32.totalorder %s461_s10, %s457_s9  ;;  %p693_p1 = scmp.eq.s32.totalorder %s510_s13, 0 }
   0x8   : > { %p90_p3 = scmp.eq.s32.totalorder %s270_s14, 1  ;;  %p271_p5 = scmp.ge.s32.totalorder %s469_s12, 1 }
   0x9   : > { %p519_p4 = por %p693_p1, %p39_p0  ;;  %p97_p7 = scmp.lt.s32.totalorder %s469_s12, 3 }
   0xa   : > { %p524_p6 = por %p90_p3, %p39_p0  ;;  %s471_s18 = smov [#allocation5]  }
   0xb   : > { %s696_s15 = scalar_select %p519_p4, 1, 0 }
   0xc   : > { %s697_s16 = scalar_select %p524_p6, 1, 0 }
   0xd   : > { %p529_p8 = pnand %p271_p5, %p97_p7  ;;  %s110_s19 = sshll.u32 %s471_s18, 4  ;;  %s111_s19 = int_to_ptr.vmem [resolvable:$true] %s110_s19 }
   0xe   : > { %s537_s20 = sadd.s32 1, %s469_s12   ;;  %s26_s24 = sadd.s32 1, %s465_s11 }
   0xf   : > { %s698_s17 = scalar_select %p529_p8, 1, 0 }
  0x10   : > { %p292_p10 = pneg %p529_p8  ;;  %s23_s22 = ssub.s32 %s469_s12, %s537_s20 }
  0x11   : > { %p547_p12 = scmp.eq.s32.totalorder %s23_s22, 0  ;;  %s341_s27 = scalar_lea.hbm %s691_s1, 128 }
  0x12   : > { %p541_p11 = pnand %p292_p10, %p693_p1  ;;  %p342_p0 = scmp.ne.s32.totalorder %s691_s1, %s341_s27 }
  0x13   : > { %s700_s23 = scalar_select %p547_p12, 1, 0 }
  0x14   : > { %p343_p3 = pneg %p541_p11  ;;  %p348_p10 = scmp.lt.u32.totalorder %s341_s27, %s691_s1 }
  0x16   : > { %p344_p5 = pnand %p343_p3, %p342_p0 }
  0x18   : > { %p345_p7 = pneg %p344_p5 }
  0x1a   : > { %p350_p9 = pnand %p348_p10, %p345_p7 }
  0x1c   : > { %353 = shalt.err (!%p350_p9)
}
  0x1d   : > { %s354_s4 = scalar_lea.vmem %s111_s19, 128  ;;  %p362_p6 = scmp.lt.s32.totalorder %s111_s19, %s111_s19 }
  0x1e   : > { %p355_p1 = scmp.ne.s32.totalorder %s111_s19, %s354_s4  ;;  %p363_p4 = scmp.lt.s32.totalorder %s354_s4, %s354_s4 }
  0x20   : > { %p357_p2 = pnand %p355_p1, %p343_p3  ;;  %p364_p8 = por %p363_p4, %p362_p6 }
  0x22   : > { %p358_p13 = pneg %p357_p2 }
  0x24   : > { %p365_p12 = pnand %p364_p8, %p358_p13 }
  0x26   : > { %368 = shalt.err (!%p365_p12)
}
  0x27   : > { %295 = dma.hbm_to_vmem [thread:$0]  (!%p541_p11), %s691_s1, 128, %s111_s19, [#allocation6]  }
  0x28   : > { %p701_p1 = scmp.ne.s32.totalorder %s700_s23, 0  ;;  %p34_p2 = scmp.eq.s32.totalorder %s469_s12, 0 }
  0x29   : > { %p702_p4 = scmp.ne.s32.totalorder %s465_s11, %s461_s10  ;;  %p703_p6 = scmp.eq.s32.totalorder %s510_s13, 1 }
  0x2a   : > { %s573_s7 = scalar_select %p701_p1, %s465_s11, %s26_s24  }
  0x2b   : > { %p581_p8 = por %p703_p6, %p702_p4  ;;  %p305_p9 = scmp.lt.s32.totalorder %s469_s12, 2 }
  0x2c   : > { %s121_s14 = sand.u32 1, %s465_s11   ;;  %p705_p12 = pmov %p702_p4 }
  0x2d   : > { %s274_s18 = sshll.u32 %s121_s14, 3  ;;  %s275_s21 = sshll.u32 %s469_s12, 7 }
  0x2e   : > { %p35_p13 = por %p34_p2, %p705_p12  ;;  %s594_s19 = scalar_lea.hbm %s690_s0, %s275_s21 }
  0x2f   : > { %s125_s23 = scalar_lea.vmem [#allocation2], %s274_s18  ;;  %s122_s27 = scalar_lea.sflag [#allocation3], %s121_s14 }
  0x30   : > { %s132_s24 = sshll.u32 %s125_s23, 4  ;;  %p596_p11 = pnand %p305_p9, %p35_p13  ;;  %s600_s24 = int_to_ptr.vmem [resolvable:$true] %s132_s24 }
  0x31   : > { %s369_s28 = scalar_lea.hbm %s594_s19, 128  ;;  %s374_s3 = scalar_lea.hbm %s690_s0, 256 }
  0x32   : > { %p370_p0 = scmp.ne.s32.totalorder %s594_s19, %s369_s28  ;;  %p371_p3 = pneg %p596_p11 }
  0x33   : > { %p375_p10 = scmp.lt.u32.totalorder %s594_s19, %s690_s0  ;;  %p376_p1 = scmp.lt.u32.totalorder %s374_s3, %s369_s28 }
  0x34   : > { %p372_p5 = pnand %p371_p3, %p370_p0  ;;  %p378_p4 = scmp.lt.u32.totalorder %s369_s28, %s594_s19 }
  0x35   : > { %p377_p2 = por %p376_p1, %p375_p10 }
  0x36   : > { %p373_p7 = pneg %p372_p5 }
  0x37   : > { %p379_p6 = por %p378_p4, %p377_p2 }
  0x39   : > { %p380_p9 = pnand %p379_p6, %p373_p7 }
  0x3b   : > { %383 = shalt.err (!%p380_p9)
}
  0x3c   : > { %s384_s6 = scalar_lea.vmem %s600_s24, 128  ;;  %s472_s14 = smov [#allocation2]  }
  0x3d   : > { %p385_p12 = scmp.ne.s32.totalorder %s600_s24, %s384_s6  ;;  %s389_s18 = sshll.u32 %s472_s14, 4  ;;  %s390_s18 = int_to_ptr.vmem [resolvable:$false] %s389_s18 }
  0x3e   : > { %s391_s21 = scalar_lea.vmem %s390_s18, 256  ;;  %p392_p5 = scmp.lt.s32.totalorder %s600_s24, %s390_s18 }
  0x3f   : > { %p387_p13 = pnand %p385_p12, %p371_p3  ;;  %p393_p10 = scmp.lt.s32.totalorder %s391_s21, %s384_s6 }
  0x41   : > { %p388_p0 = pneg %p387_p13  ;;  %p394_p1 = por %p393_p10, %p392_p5 }
  0x43   : > { %p395_p2 = pnand %p394_p1, %p388_p0 }
  0x45   : > { %398 = shalt.err (!%p395_p2)
}
  0x46   : > { %299 = dma.hbm_to_vmem [thread:$0]  (!%p596_p11), %s594_s19, 128, %s600_s24, %s122_s27  }
  0x47   : > { %p707_p7 = scmp.ne.s32.totalorder %s698_s17, 0 }
  0x48   : > { %s630_s22 = sand.u32 (!%p707_p7), 1, %s461_s10   ;;  %p708_p3 = scmp.ne.s32.totalorder (!%p707_p7), %s696_s15, 0 }
  0x49   : > { %141 = sbr.rel (%p707_p7) target bundleno = 109 (0x6d), region = 28  ;;  %s277_s25 = sshll.u32 (!%p707_p7), %s630_s22, 3 }
  0x4a   : > { %s144_s23 = scalar_lea.sflag (!%p707_p7), [#allocation3], %s630_s22  ;;  %s147_s28 = scalar_lea.vmem (!%p707_p7), [#allocation2], %s277_s25 }
  0x50   : > { %444 = dma.done.wait (%p708_p3), %s144_s23, 128  }
  0x51   : > { %446 = vsyncadd (%p708_p3), %s144_s23, 4294967168  ;;  %p709_p4 = scmp.eq.s32.totalorder %s510_s13, 0 }
  0x53   : > { %448 = dma.done.wait (%p709_p4), [#allocation6], 128   ;;  %p710_p11 = pmov %p709_p4 }
  0x54   : > { %s171_s17 = scalar_lea.vmem [#allocation7], %s277_s25  ;;  %s281_s24 = sshll.u32 %s510_s13, 7  ;;  %v172_v0 = vld [vmem:[%s147_s28] sm:$0xff]  ;;  %v173_v1 = vld [vmem:[#allocation5] sm:$0xff] }
  0x55   : > { %450 = vsyncadd (%p710_p11), [#allocation6], 4294967168  ;;  %s190_s19 = sshll.u32 %s171_s17, 4  ;;  %v174_v2 = vadd.f32 %v173_v1, %v172_v0  ;;  %s648_s27 = scalar_lea.hbm %s692_s2, %s281_s24  ;;  %s643_s19 = int_to_ptr.vmem [resolvable:$true] %s190_s19 }
  0x56   : > { %s177_s29 = scalar_lea.sflag [#allocation4], %s630_s22  ;;  %s399_s30 = scalar_lea.vmem %s643_s19, 128 }
  0x57   : > { %175 = vst [vmem:[%s171_s17] sm:$0xff] %v174_v2  ;;  %p400_p6 = scmp.ne.s32.totalorder %s643_s19, %s399_s30  ;;  %s473_s13 = smov [#allocation7]  }
  0x58   : > { %s403_s3 = sshll.u32 %s473_s13, 4  ;;  %s404_s3 = int_to_ptr.vmem [resolvable:$false] %s403_s3 }
  0x59   : > { %p401_p9 = pnand %p400_p6, %p581_p8  ;;  %s405_s4 = scalar_lea.vmem %s404_s3, 256 }
  0x5a   : > { %p406_p13 = scmp.lt.s32.totalorder %s643_s19, %s404_s3  ;;  %p407_p0 = scmp.lt.s32.totalorder %s405_s4, %s399_s30 }
  0x5b   : > { %p402_p12 = pneg %p401_p9 }
  0x5c   : > { %p408_p5 = por %p407_p0, %p406_p13 }
  0x5e   : > { %p409_p10 = pnand %p408_p5, %p402_p12 }
  0x60   : > { %412 = shalt.err (!%p409_p10)
}
  0x61   : > { %s413_s5 = scalar_lea.hbm %s648_s27, 128  ;;  %s417_s18 = scalar_lea.hbm %s692_s2, 256 }
  0x62   : > { %p414_p1 = scmp.ne.s32.totalorder %s648_s27, %s413_s5  ;;  %p418_p3 = scmp.lt.u32.totalorder %s648_s27, %s692_s2 }
  0x63   : > { %p419_p4 = scmp.lt.u32.totalorder %s417_s18, %s413_s5  ;;  %p421_p6 = scmp.lt.u32.totalorder %s413_s5, %s648_s27 }
  0x64   : > { %p415_p2 = pnand %p414_p1, %p581_p8 }
  0x65   : > { %p420_p11 = por %p419_p4, %p418_p3 }
  0x66   : > { %p416_p7 = pneg %p415_p2 }
  0x67   : > { %p422_p9 = por %p421_p6, %p420_p11 }
  0x69   : > { %p423_p12 = pnand %p422_p9, %p416_p7 }
  0x6b   : > { %426 = shalt.err (!%p423_p12)
}
  0x6c   : > { %290 = dma.vmem_to_hbm [thread:$0]  (%p581_p8), %s643_s19, 128, %s648_s27, %s177_s29  }
  0x6d PF: > { %s202_s25 = sand.u32 1, %s457_s9   ;;  %p711_p13 = scmp.ne.s32.totalorder %s697_s16, 0 }
  0x6e   : > { %p712_p0 = scmp.ge.s32.totalorder %s469_s12, 2  ;;  %s203_s23 = scalar_lea.sflag [#allocation4], %s202_s25 }
  0x70   : > { %p301_p5 = pnand %p712_p0, %p711_p13 }
  0x72   : > { %452 = dma.done.wait (!%p301_p5), %s203_s23, 128  }
  0x73   : > { %454 = vsyncadd (!%p301_p5), %s203_s23, 4294967168  ;;  %p16_p10 = scmp.ge.s32.totalorder %s537_s20, 4   ;;  %s713_s9 = smov %s461_s10 }
  0x74   : > { %s714_s10 = smov %s465_s11  ;;  %s715_s11 = smov %s573_s7 }
  0x75   : > { %s716_s12 = smov %s537_s20  ;;  %18 = sbr.rel (!%p16_p10) target bundleno = 6 (0x6), region = 77 }
  0x7c   :  { %208 = vsyncpa [#allocation3], 1 }
  0x7d   :  { %210 = vsyncpa [#allocation3 + $0x1], 1 }
  0x7e   :  { %211 = vsyncpa [#allocation6], 1 }
  0x7f   :  { %212 = vsyncpa [#allocation4], 1 }
  0x80   :  { %214 = vsyncpa [#allocation4 + $0x1], 1 }

// kernel: tpu_custom_call.1
= control target key start
LH: loop header
LB: loop body
LE: loop exit
PB: predicated region body
PF: predicated region fallthrough
CT: control target
= control target key end

     0   :  { %10 = vsyncpa [#allocation3], 0  ;;  %s663_s0 = inlined_call_operand.hbm [shape: f32[16,128], index: 0, kind: input, shape index: {}]   ;;  %s664_s1 = inlined_call_operand.hbm [shape: f32[128,128], index: 1, kind: input, shape index: {}]   ;;  %s665_s2 = inlined_call_operand.vmem [shape: f32[1,128], index: 2, kind: input, shape index: {}]   ;;  %s666_s3 = inlined_call_operand.hbm [shape: f32[128,128], index: 3, kind: input, shape index: {}]   ;;  %s667_s4 = inlined_call_operand.vmem [shape: f32[1,128], index: 4, kind: input, shape index: {}]   ;;  %s668_s5 = inlined_call_operand.hbm [shape: f32[16,128], index: 5, kind: output, shape index: {}]  }
   0x1   :  { %11 = vsyncpa [#allocation6], 0 }
   0x2   :  { %12 = vsyncpa [#allocation4], 0  ;;  %s554_s18 = smov [#allocation5]   ;;  %s555_s20 = smov [#allocation2]  }
   0x3   :  { %s30_s19 = sshll.u32 %s554_s18, 4  ;;  %s18_s21 = sshll.u32 %s555_s20, 4  ;;  %s31_s19 = int_to_ptr.vmem [resolvable:$true] %s30_s19  ;;  %s590_s21 = int_to_ptr.vmem [resolvable:$true] %s18_s21 }
   0x4   :  { %s460_s24 = scalar_lea.hbm %s664_s1, 2048 }
   0x5   :  { %p461_p0 = scmp.ne.s32.totalorder %s664_s1, %s460_s24  ;;  %p464_p1 = scmp.lt.u32.totalorder %s460_s24, %s664_s1 }
   0x7   :  { %p466_p2 = pnand %p464_p1, %p461_p0 }
   0x9   :  { %469 = shalt.err (!%p466_p2)
}
   0xa   :  { %s470_s29 = scalar_lea.vmem %s31_s19, 2048  ;;  %p475_p4 = scmp.lt.s32.totalorder %s31_s19, %s31_s19 }
   0xb   :  { %p471_p3 = scmp.ne.s32.totalorder %s31_s19, %s470_s29  ;;  %p476_p5 = scmp.lt.s32.totalorder %s470_s29, %s470_s29 }
   0xd   :  { %p477_p6 = por %p476_p5, %p475_p4 }
   0xf   :  { %p478_p7 = pnand %p477_p6, %p471_p3 }
  0x11   :  { %481 = shalt.err (!%p478_p7)
}
  0x12   :  { %s556_s30 = smov 128   ;;  %s557_s6 = smov 8  }
  0x13   :  { %36 = dma.hbm_to_vmem [thread:$0]  %s664_s1, 2048, %s31_s19, [#allocation6], %s556_s30, %s556_s30, %s557_s6  }
  0x14   :  { %s482_s11 = scalar_lea.hbm %s663_s0, 256 }
  0x15   :  { %p483_p8 = scmp.ne.s32.totalorder %s663_s0, %s482_s11  ;;  %p486_p9 = scmp.lt.u32.totalorder %s482_s11, %s663_s0 }
  0x17   :  { %p488_p10 = pnand %p486_p9, %p483_p8 }
  0x19   :  { %491 = shalt.err (!%p488_p10)
}
  0x1a   :  { %s492_s16 = scalar_lea.vmem %s590_s21, 256  ;;  %p497_p12 = scmp.lt.s32.totalorder %s590_s21, %s590_s21 }
  0x1b   :  { %p493_p11 = scmp.ne.s32.totalorder %s590_s21, %s492_s16  ;;  %p498_p13 = scmp.lt.s32.totalorder %s492_s16, %s492_s16 }
  0x1d   :  { %p499_p0 = por %p498_p13, %p497_p12 }
  0x1f   :  { %p500_p1 = pnand %p499_p0, %p493_p11 }
  0x21   :  { %503 = shalt.err (!%p500_p1)
}
  0x22   :  { %24 = dma.hbm_to_vmem [thread:$0]  %s663_s0, 256, %s590_s21, [#allocation3], %s556_s30, %s556_s30, %s557_s6  }
  0x23   :  { %s558_s18 = smov [#allocation7]   ;;  %s504_s23 = scalar_lea.hbm %s666_s3, 2048 }
  0x24   :  { %s44_s19 = sshll.u32 %s558_s18, 4  ;;  %p505_p2 = scmp.ne.s32.totalorder %s666_s3, %s504_s23  ;;  %s45_s19 = int_to_ptr.vmem [resolvable:$true] %s44_s19 }
  0x25   :  { %p508_p3 = scmp.lt.u32.totalorder %s504_s23, %s666_s3 }
  0x27   :  { %p510_p4 = pnand %p508_p3, %p505_p2 }
  0x29   :  { %513 = shalt.err (!%p510_p4)
}
  0x2a   :  { %s514_s28 = scalar_lea.vmem %s45_s19, 2048  ;;  %p519_p6 = scmp.lt.s32.totalorder %s45_s19, %s45_s19 }
  0x2b   :  { %p515_p5 = scmp.ne.s32.totalorder %s45_s19, %s514_s28  ;;  %p520_p7 = scmp.lt.s32.totalorder %s514_s28, %s514_s28 }
  0x2d   :  { %p521_p8 = por %p520_p7, %p519_p6 }
  0x2f   :  { %p522_p9 = pnand %p521_p8, %p515_p5 }
  0x31   :  { %525 = shalt.err (!%p522_p9)
}
  0x32   :  { %50 = dma.hbm_to_vmem [thread:$0]  %s666_s3, 2048, %s45_s19, [#allocation6], %s556_s30, %s556_s30, %s557_s6  }
  0x33   :  { %548 = dma.done.wait [#allocation3], 256  }
  0x34   :  { %549 = vsyncadd [#allocation3], 4294967040 }
  0x35   :  { %550 = dma.done.wait [#allocation6], 4096  }
  0x36   :  { %551 = vsyncadd [#allocation6], 4294963200  ;;  %v64_v0 = vld [vmem:[#allocation5] sm:$0xff]  ;;  %v65_v1 = vld [vmem:[#allocation5 + $0x8] sm:$0xff]  ;;  %s559_s9 = smov [#allocation8]  }
  0x37   :  { %v66_v2 = vld [vmem:[#allocation5 + $0x10] sm:$0xff]  ;;  %v390_v3 = vpack.c.bf16 %v65_v1, %v64_v0  ;;  %v67_v4 = vld [vmem:[#allocation5 + $0x18] sm:$0xff]  ;;  %v68_v6 = vld [vmem:[#allocation5 + $0x20] sm:$0xff]  ;;  %s269_s10 = sshll.u32 %s559_s9, 4  ;;  %s270_s10 = int_to_ptr.vmem [resolvable:$true] %s269_s10 }
  0x38   :  { %v394_v5 = vpack.c.bf16 %v67_v4, %v66_v2  ;;  %v69_v7 = vld [vmem:[#allocation5 + $0x28] sm:$0xff]  ;;  %v70_v9 = vld [vmem:[#allocation5 + $0x30] sm:$0xff]  ;;  %v71_v10 = vld [vmem:[#allocation5 + $0x38] sm:$0xff]  ;;  %p531_p11 = scmp.lt.s32.totalorder %s270_s10, %s270_s10 }
  0x39   :  { %391 = vmatprep.subr.bf16.mxu0 %v390_v3  ;;  %v398_v8 = vpack.c.bf16 %v69_v7, %v68_v6  ;;  %v62_v11 = vld [vmem:[#allocation2] sm:$0xff]  ;;  %v164_v12 = vld [vmem:[#allocation7] sm:$0xff]  ;;  %v165_v13 = vld [vmem:[#allocation7 + $0x8] sm:$0xff]  ;;  %v402_v20 = vpack.c.bf16 %v71_v10, %v70_v9 }
  0x3a   :  { %393 = vmatpush3.bf16.msra.mxu0 %v390_v3  ;;  %352 = vmatprep.mubr.f32.mxu0 %v62_v11  ;;  %v166_v14 = vld [vmem:[#allocation7 + $0x10] sm:$0xff]  ;;  %v422_v15 = vpack.c.bf16 %v165_v13, %v164_v12  ;;  %v167_v16 = vld [vmem:[#allocation7 + $0x18] sm:$0xff]  ;;  %v168_v18 = vld [vmem:[#allocation7 + $0x20] sm:$0xff] }
  0x3b   :  { %395 = vmatprep.subr.bf16.mxu0 %v394_v5  ;;  %v426_v17 = vpack.c.bf16 %v167_v16, %v166_v14  ;;  %v169_v19 = vld [vmem:[#allocation7 + $0x28] sm:$0xff]  ;;  %v72_v21 = vld [vmem:[#allocation5 + $0x40] sm:$0xff]  ;;  %v170_v24 = vld [vmem:[#allocation7 + $0x30] sm:$0xff] }
  0x3c   :  { %423 = vmatprep.subr.bf16.mxu1 %v422_v15  ;;  %v73_v22 = vld [vmem:[#allocation5 + $0x48] sm:$0xff]  ;;  %v430_v23 = vpack.c.bf16 %v169_v19, %v168_v18  ;;  %v171_v25 = vld [vmem:[#allocation7 + $0x38] sm:$0xff]  ;;  %v74_v27 = vld [vmem:[#allocation5 + $0x50] sm:$0xff] }
  0x3d   :  { %425 = vmatpush3.bf16.msra.mxu1 %v422_v15  ;;  %v406_v26 = vpack.c.bf16 %v73_v22, %v72_v21  ;;  %v75_v28 = vld [vmem:[#allocation5 + $0x58] sm:$0xff]  ;;  %v434_v29 = vpack.c.bf16 %v171_v25, %v170_v24  ;;  %v172_v30 = vld [vmem:[#allocation7 + $0x40] sm:$0xff]  ;;  %v173_v31 = vld [vmem:[#allocation7 + $0x48] sm:$0xff] }
  0x3e   :  { %397 = vmatpush3.bf16.msra.mxu0 %v394_v5  ;;  %427 = vmatprep.subr.bf16.mxu1 %v426_v17  ;;  %v410_v32 = vpack.c.bf16 %v75_v28, %v74_v27  ;;  %v76_v33 = vld [vmem:[#allocation5 + $0x60] sm:$0xff]  ;;  %v77_v34 = vld [vmem:[#allocation5 + $0x68] sm:$0xff]  ;;  %v438_v35 = vpack.c.bf16 %v173_v31, %v172_v30  ;;  %v174_v36 = vld [vmem:[#allocation7 + $0x50] sm:$0xff] }
  0x3f   :  { %399 = vmatprep.subr.bf16.mxu0 %v398_v8  ;;  %v175_v37 = vld [vmem:[#allocation7 + $0x58] sm:$0xff]  ;;  %v414_v38 = vpack.c.bf16 %v77_v34, %v76_v33  ;;  %v78_v39 = vld [vmem:[#allocation5 + $0x70] sm:$0xff]  ;;  %v176_v42 = vld [vmem:[#allocation7 + $0x60] sm:$0xff] }
  0x40   :  { %v79_v40 = vld [vmem:[#allocation5 + $0x78] sm:$0xff]  ;;  %v442_v41 = vpack.c.bf16 %v175_v37, %v174_v36  ;;  %v177_v43 = vld [vmem:[#allocation7 + $0x68] sm:$0xff]  ;;  %v178_v47 = vld [vmem:[#allocation7 + $0x70] sm:$0xff] }
  0x41   :  { %429 = vmatpush3.bf16.msra.mxu1 %v426_v17  ;;  %v418_v44 = vpack.c.bf16 %v79_v40, %v78_v39  ;;  %v446_v45 = vpack.c.bf16 %v177_v43, %v176_v42  ;;  %v63_v46 = vld [vmem:[#allocation2 + $0x8] sm:$0xff]  ;;  %v282_v50 = vld [vmem:[%s665_s2] ss:$0 sm:$0xff]  ;;  %s526_s2 = scalar_lea.vmem %s270_s10, 256 }
  0x42   :  { %401 = vmatpush3.bf16.msra.mxu0 %v398_v8  ;;  %431 = vmatprep.subr.bf16.mxu1 %v430_v23  ;;  %v179_v48 = vld [vmem:[#allocation7 + $0x78] sm:$0xff]  ;;  %v283_v57 = vld [vmem:[%s667_s4] ss:$0 sm:$0xff]  ;;  %p527_p10 = scmp.ne.s32.totalorder %s270_s10, %s526_s2  ;;  %p532_p12 = scmp.lt.s32.totalorder %s526_s2, %s526_s2 }
  0x43   :  { %403 = vmatprep.subr.bf16.mxu0 %v402_v20  ;;  %v450_v49 = vpack.c.bf16 %v179_v48, %v178_v47 }
  0x44   :  { %p533_p13 = por %p532_p12, %p531_p11 }
  0x45   :  { %433 = vmatpush3.bf16.msra.mxu1 %v430_v23 }
  0x46   :  { %405 = vmatpush3.bf16.msra.mxu0 %v402_v20  ;;  %435 = vmatprep.subr.bf16.mxu1 %v434_v29  ;;  %p534_p0 = pnand %p533_p13, %p527_p10 }
  0x47   :  { %407 = vmatprep.subr.bf16.mxu0 %v406_v26 }
  0x49   :  { %437 = vmatpush3.bf16.msra.mxu1 %v434_v29 }
  0x4a   :  { %409 = vmatpush3.bf16.msra.mxu0 %v406_v26  ;;  %439 = vmatprep.subr.bf16.mxu1 %v438_v35 }
  0x4b   :  { %411 = vmatprep.subr.bf16.mxu0 %v410_v32 }
  0x4d   :  { %441 = vmatpush3.bf16.msra.mxu1 %v438_v35 }
  0x4e   :  { %413 = vmatpush3.bf16.msra.mxu0 %v410_v32  ;;  %443 = vmatprep.subr.bf16.mxu1 %v442_v41 }
  0x4f   :  { %415 = vmatprep.subr.bf16.mxu0 %v414_v38 }
  0x51   :  { %445 = vmatpush3.bf16.msra.mxu1 %v442_v41 }
  0x52   :  { %417 = vmatpush3.bf16.msra.mxu0 %v414_v38  ;;  %447 = vmatprep.subr.bf16.mxu1 %v446_v45 }
  0x53   :  { %419 = vmatprep.subr.bf16.mxu0 %v418_v44 }
  0x55   :  { %449 = vmatpush3.bf16.msra.mxu1 %v446_v45 }
  0x56   :  { %421 = vmatpush3.bf16.msra.mxu0 %v418_v44  ;;  %451 = vmatprep.subr.bf16.mxu1 %v450_v49 }
  0x59   :  { %353 = vmatmul.mubr.f32.vlgmr.msra.gmra.mrb[0].mxu0 %v63_v46  ;;  %453 = vmatpush3.bf16.msra.mxu1 %v450_v49 }
 0x12c   :  { %v354_v51 = vpop.f32.mrb[0].mxu0 }
 0x12d   :  { %v159_v52 = vadd.f32 %v354_v51, %v282_v50  ;;  %v153_v53 = vpop.f32.mrb[1].mxu0 }
 0x12e   :  { %v154_v54 = vadd.f32 %v282_v50, %v153_v53 }
 0x12f   :  { %v163_v56 = vmax.f32 %v159_v52, 0.0 }
 0x130   :  { %v162_v55 = vmax.f32 %v154_v54, 0.0 }
 0x132   :  { %387 = vmatprep.mubr.f32.mxu1 %v162_v55 }
 0x133   :  { %388 = vmatmul.mubr.f32.vlgmr.msra.gmra.mrb[0].mxu1 %v163_v56 }
 0x206   :  { %v389_v58 = vpop.f32.mrb[0].mxu1 }
 0x207   :  { %v259_v59 = vadd.f32 %v389_v58, %v283_v57  ;;  %v253_v60 = vpop.f32.mrb[1].mxu1 }
 0x208   :  { %v254_v61 = vadd.f32 %v283_v57, %v253_v60 }
 0x209   :  { %263 = vst [vmem:[#allocation8 + $0x8] sm:$0xff] %v259_v59 }
 0x20a   :  { %262 = vst [vmem:[#allocation8] sm:$0xff] %v254_v61 }
 0x20b   :  { %537 = shalt.err (!%p534_p0)
}
 0x20c   :  { %s538_s4 = scalar_lea.hbm %s668_s5, 256 }
 0x20d   :  { %p539_p1 = scmp.ne.s32.totalorder %s668_s5, %s538_s4  ;;  %p542_p2 = scmp.lt.u32.totalorder %s538_s4, %s668_s5 }
 0x20f   :  { %p544_p3 = pnand %p542_p2, %p539_p1 }
 0x211   :  { %547 = shalt.err (!%p544_p3)
}
 0x212   :  { %275 = dma.vmem_to_hbm [thread:$0]  %s270_s10, 256, %s668_s5, [#allocation4], %s556_s30, %s556_s30, %s557_s6  }
 0x213   :  { %552 = dma.done.wait [#allocation4], 256  }
 0x214   :  { %553 = vsyncadd [#allocation4], 4294967040 }
 0x215   :  { %279 = vsyncpa [#allocation3], 1 }
 0x216   :  { %280 = vsyncpa [#allocation6], 1 }
 0x217   :  { %281 = vsyncpa [#allocation4], 1 }

</bundles_post_ra>
